<compile_context>
chip_gen: v5e
topology: v5e:2x2
jax: 0.10.0
libtpu: 0.0.40
codegen_flags: <defaults>
</compile_context>

<pallas_src>
import functools

import jax
import jax.numpy as jnp
import numpy as np
from jax import lax
from jax.experimental import pallas as pl
from jax.experimental.pallas import tpu as pltpu


def _nth_root(x, g):
    """x ** (1/g) with repeated sqrt for power-of-two factors (EUP-friendly)."""
    if g == 1:
        return x
    while g % 2 == 0:
        x = jnp.sqrt(x)
        g //= 2
    if g > 1:
        x = x ** (1.0 / g)
    return x


def _vmem_limit_bytes():
    """Generation-aware scoped-VMEM limit: ~96 MiB on v5e/v6e (128 MiB physical),
    ~48 MiB on v7x (64 MiB physical), leaving double-buffer headroom."""
    phys = 64 * 1024 * 1024
    try:
        info = pltpu.get_tpu_info()
        cap = getattr(info, "vmem_capacity_bytes", None)
        if cap:
            phys = int(cap)
    except Exception:
        pass
    return min((phys * 3) // 4, 100 * 1024 * 1024)


def _tap_accumulate(xg, w_ref, *, KH, KW, dilation, Wp, Lout):
    """Sum over KH*KW taps of  w[t] (M,Cin) @ x_shifted (Cin,Lout), f32 accum.

    xg    : (Cin, Lpad) bf16 value (flat padded spatial on lanes)
    w_ref : (1, KH*KW, M, Cin) bf16 ref
    """
    acc = None
    for ki in range(KH):
        for kj in range(KW):
            off = ki * dilation * Wp + kj * dilation          # static lane offset
            xs = lax.slice_in_dim(xg, off, off + Lout, axis=1)  # (Cin, Lout) bf16
            wt = w_ref[0, ki * KW + kj]                         # (M, Cin) bf16
            p = jnp.dot(wt, xs, preferred_element_type=jnp.float32)
            acc = p if acc is None else acc + p
    return acc                                                  # (M, Lout) f32


def _group_product_tail(up, o_ref, prod_ref, G):
    """Accumulate the over-groups product in f32 scratch; finalize at g==G-1."""
    g = pl.program_id(1)

    @pl.when(g == 0)
    def _():
        prod_ref[...] = up

    @pl.when(g != 0)
    def _():
        prod_ref[...] = prod_ref[...] * up

    @pl.when(g == G - 1)
    def _():
        o_ref[0] = _nth_root(prod_ref[...], G).astype(o_ref.dtype)


def _lora_group_kernel_fused(x_ref, w_ref, o_ref, prod_ref, *,
                             G, KH, KW, dilation, Wp, Lout):
    """Pre-fused (Wu@Wd) path: one dot per tap per group.

    x_ref : (1, 1, Cin, Lpad) bf16,  w_ref: (1, KH*KW, Cout, Cin) bf16
    o_ref : (1, Cout, Lout) bf16,    prod_ref: (Cout, Lout) f32 scratch
    """
    xg = x_ref[0, 0]                                            # (Cin, Lpad)
    up = _tap_accumulate(xg, w_ref, KH=KH, KW=KW, dilation=dilation,
                         Wp=Wp, Lout=Lout)                      # (Cout, Lout) f32
    _group_product_tail(up, o_ref, prod_ref, G)


def _lora_group_kernel_twodot(x_ref, wd_ref, wu_ref, o_ref, prod_ref, *,
                              G, KH, KW, dilation, Wp, Lout):
    """Two-dot path (large Cin): lora_down per tap, then 1x1 lora_up.

    x_ref : (1, 1, Cin, Lpad) bf16,  wd_ref: (1, KH*KW, RG, Cin) bf16
    wu_ref: (1, Cout, RG) bf16,      o_ref : (1, Cout, Lout) bf16
    """
    xg = x_ref[0, 0]
    down = _tap_accumulate(xg, wd_ref, KH=KH, KW=KW, dilation=dilation,
                           Wp=Wp, Lout=Lout)                    # (RG, Lout) f32
    up = jnp.dot(wu_ref[0], down.astype(jnp.bfloat16),
                 preferred_element_type=jnp.float32)            # (Cout, Lout) f32
    _group_product_tail(up, o_ref, prod_ref, G)


def lora_conv2d_group_forward(x_nchw, w_down, w_up, *, rank_groups,
                              stride=1, padding=1, dilation=1):
    B, Cin_tot, H, W = x_nchw.shape
    G = int(rank_groups)
    assert Cin_tot % G == 0 and w_down.shape[0] % G == 0 and w_up.shape[0] % G == 0
    Cin = Cin_tot // G
    rank, _, KH, KW = w_down.shape
    RG = rank // G
    Cout = w_up.shape[0] // G
    KC = KH * KW * Cin
    T = KH * KW

    Hp = H + 2 * padding
    Wp = W + 2 * padding
    Ho = (H + 2 * padding - dilation * (KH - 1) - 1) // stride + 1
    Wo = (W + 2 * padding - dilation * (KW - 1) - 1) // stride + 1
    Ho1 = Hp - dilation * (KH - 1)          # stride-1 output rows computed in-kernel
    Lout = Ho1 * Wp                         # flat output lanes (incl. ghost columns)
    extra = (KW - 1) * dilation             # tail pad so the last tap slice is in-bounds
    Lpad = Hp * Wp + extra

    # ---- glue (plain JAX): pad, flatten spatial to the lane axis, group split ----
    x_pad = jnp.pad(x_nchw, ((0, 0), (0, 0), (padding, padding), (padding, padding)))
    x_flat = x_pad.reshape(B, G, Cin, Hp * Wp)
    if extra:
        x_flat = jnp.pad(x_flat, ((0, 0), (0, 0), (0, 0), (0, extra)))
    x_flat = x_flat.astype(jnp.bfloat16)

    wd_g = w_down.reshape(G, RG, Cin, KH, KW).astype(jnp.float32)
    wu_g = w_up.reshape(G, Cout, RG).astype(jnp.float32)

    # Fuse Wu@Wd when the fused per-tap matmul is not much bigger than the two-dot
    # path (review gate: Cout*KC <= 2*(RG*KC + Cout*RG)).
    fuse = Cout * KC <= 2 * (RG * KC + Cout * RG)

    if fuse:
        w_eff = jnp.einsum('gor,grckl->gockl', wu_g, wd_g)      # (G,Cout,Cin,KH,KW) f32
        w_taps = (w_eff.transpose(0, 3, 4, 1, 2)
                       .reshape(G, T, Cout, Cin).astype(jnp.bfloat16))
        kernel = functools.partial(_lora_group_kernel_fused, G=G, KH=KH, KW=KW,
                                   dilation=dilation, Wp=Wp, Lout=Lout)
        inputs = (x_flat, w_taps)
        in_specs = [
            pl.BlockSpec((1, 1, Cin, Lpad), lambda b, g: (b, g, 0, 0)),
            pl.BlockSpec((1, T, Cout, Cin), lambda b, g: (g, 0, 0, 0)),
        ]
    else:
        wd_taps = (wd_g.transpose(0, 3, 4, 1, 2)
                       .reshape(G, T, RG, Cin).astype(jnp.bfloat16))
        wu_b = wu_g.astype(jnp.bfloat16)
        kernel = functools.partial(_lora_group_kernel_twodot, G=G, KH=KH, KW=KW,
                                   dilation=dilation, Wp=Wp, Lout=Lout)
        inputs = (x_flat, wd_taps, wu_b)
        in_specs = [
            pl.BlockSpec((1, 1, Cin, Lpad), lambda b, g: (b, g, 0, 0)),
            pl.BlockSpec((1, T, RG, Cin), lambda b, g: (g, 0, 0, 0)),
            pl.BlockSpec((1, Cout, RG), lambda b, g: (g, 0, 0)),
        ]

    out = pl.pallas_call(
        kernel,
        out_shape=jax.ShapeDtypeStruct((B, Cout, Lout), jnp.bfloat16),
        grid_spec=pltpu.PrefetchScalarGridSpec(
            num_scalar_prefetch=0,
            grid=(B, G),                     # group axis = trailing reduction axis
            in_specs=in_specs,
            out_specs=pl.BlockSpec((1, Cout, Lout), lambda b, g: (b, 0, 0)),
            scratch_shapes=[pltpu.VMEM((Cout, Lout), jnp.float32)],
        ),
        compiler_params=pltpu.CompilerParams(
            dimension_semantics=("parallel", "arbitrary"),
            vmem_limit_bytes=_vmem_limit_bytes(),
        ),
    )(*inputs)

    # ---- glue: drop ghost columns + stride decimation + cast (one fused XLA pass) ----
    out = out.reshape(B, Cout, Ho1, Wp)
    out = out[:, :, :(Ho - 1) * stride + 1:stride, :(Wo - 1) * stride + 1:stride]
    return out.astype(jnp.float16)          # torch.prod(dtype=float16) path


def reference_forward(x_nchw, w_down, w_up, *, rank_groups,
                      stride=1, padding=1, dilation=1):
    """Pure-JAX reference (grouped convs via lax.conv_general_dilated, fp32)."""
    G = rank_groups
    d = lax.conv_general_dilated(
        x_nchw, w_down,
        window_strides=(stride, stride),
        padding=((padding, padding), (padding, padding)),
        rhs_dilation=(dilation, dilation),
        dimension_numbers=('NCHW', 'OIHW', 'NCHW'),
        feature_group_count=G)
    u = lax.conv_general_dilated(
        d, w_up,
        window_strides=(1, 1),
        padding=((0, 0), (0, 0)),
        dimension_numbers=('NCHW', 'OIHW', 'NCHW'),
        feature_group_count=G)
    B, CG, Ho, Wo = u.shape
    Cout = CG // G
    u = u.reshape(B, G, Cout, Ho, Wo)
    y = jnp.prod(u, axis=1) ** (1.0 / G)
    return y.astype(jnp.float16)


def _run_case(key, *, B, Cin, Cout, H, W, G, rank, KH=3, KW=3,
              stride=1, padding=1, dilation=1):
    k1, k2, k3 = jax.random.split(key, 3)

    def bf16_round(a):  # pre-round so the bf16 kernel and fp32 reference see same values
        return a.astype(jnp.bfloat16).astype(jnp.float32)

    # Positive inputs/weights keep prod**(1/G) real-valued (torch also yields NaN
    # for negative bases with fractional exponents).
    x = bf16_round(jnp.abs(jax.random.normal(k1, (B, Cin * G, H, W), jnp.float32)))
    w_down = bf16_round(jnp.abs(jax.random.normal(k2, (rank, Cin, KH, KW), jnp.float32)) * 0.1)
    w_up = bf16_round(jnp.abs(jax.random.normal(k3, (Cout * G, rank // G, 1, 1), jnp.float32)) * 0.1)

    out = lora_conv2d_group_forward(x, w_down, w_up, rank_groups=G,
                                    stride=stride, padding=padding, dilation=dilation)
    out = jax.block_until_ready(out)

    ref = reference_forward(x, w_down, w_up, rank_groups=G,
                            stride=stride, padding=padding, dilation=dilation)
    assert out.shape == ref.shape, (out.shape, ref.shape)
    assert out.dtype == jnp.float16, out.dtype
    np.testing.assert_allclose(np.asarray(out, np.float32),
                               np.asarray(ref, np.float32),
                               rtol=2e-2, atol=2e-2)


if __name__ == "__main__":
    key = jax.random.PRNGKey(0)
    k_a, k_b = jax.random.split(key)

    # host Conv2d: in_channels=4, out_channels=8, kernel_size=3, stride=1, padding=1
    # rank=8, rank_groups=2  -> exercises the pre-fused (Wu@Wd) path.
    _run_case(k_a, B=2, Cin=4, Cout=8, H=16, W=16, G=2, rank=8)

    # Larger-channel config -> exercises the two-dot (unfused) path.
    _run_case(k_b, B=2, Cin=64, Cout=64, H=16, W=16, G=2, rank=8)

    print("KERNEL_OK")
</pallas_src>

<mosaic_0001>
module attributes {stable_mosaic.version = 11 : i64} {
  func.func @_lora_group_kernel_fused(%arg0: i32, %arg1: i32, %arg2: memref<1x1x4x326xbf16, #tpu.memory_space<vmem>>, %arg3: memref<1x9x8x4xbf16, #tpu.memory_space<vmem>>, %arg4: memref<1x8x288xbf16, #tpu.memory_space<vmem>>, %arg5: memref<8x288xf32, #tpu.memory_space<vmem>>) attributes {dimension_semantics = [#tpu.dimension_semantics<parallel>, #tpu.dimension_semantics<arbitrary>], iteration_bounds = array<i64: 2, 2>, scalar_prefetch = 0 : i64, scratch_operands = 1 : i64, tpu.core_type = #tpu.core_type<tc>, window_params = [{transform_indices = @transform_0, window_bounds = array<i64: 1, 1, 4, 326>}, {transform_indices = @transform_1, window_bounds = array<i64: 1, 9, 8, 4>}, {transform_indices = @transform_2, window_bounds = array<i64: 1, 8, 288>}]} {
    %c0 = arith.constant 0 : index
    %c0_0 = arith.constant 0 : index
    %c0_1 = arith.constant 0 : index
    %c0_2 = arith.constant 0 : index
    %0 = vector.load %arg2[%c0, %c0_0, %c0_1, %c0_2] : memref<1x1x4x326xbf16, #tpu.memory_space<vmem>>, vector<1x1x4x326xbf16>
    %1 = vector.shape_cast %0 : vector<1x1x4x326xbf16> to vector<4x326xbf16>
    %2 = vector.extract_strided_slice %1 {offsets = [0, 0], sizes = [4, 288], strides = [1, 1]} : vector<4x326xbf16> to vector<4x288xbf16>
    %c0_3 = arith.constant 0 : index
    %c0_4 = arith.constant 0 : index
    %c0_5 = arith.constant 0 : index
    %c0_6 = arith.constant 0 : index
    %3 = vector.load %arg3[%c0_3, %c0_4, %c0_5, %c0_6] : memref<1x9x8x4xbf16, #tpu.memory_space<vmem>>, vector<1x1x8x4xbf16>
    %4 = vector.shape_cast %3 : vector<1x1x8x4xbf16> to vector<8x4xbf16>
    %cst = arith.constant dense<0.000000e+00> : vector<8x288xf32>
    %5 = tpu.matmul %4, %2, %cst {dimension_numbers = #tpu.dot_dimension_numbers<[1], [0], [0], [1], [0, 0, 1, 1], [], []>} : vector<8x4xbf16>, vector<4x288xbf16>, vector<8x288xf32> -> vector<8x288xf32>
    %6 = vector.extract_strided_slice %1 {offsets = [0, 1], sizes = [4, 288], strides = [1, 1]} : vector<4x326xbf16> to vector<4x288xbf16>
    %c0_7 = arith.constant 0 : index
    %c1 = arith.constant 1 : index
    %c0_8 = arith.constant 0 : index
    %c0_9 = arith.constant 0 : index
    %7 = vector.load %arg3[%c0_7, %c1, %c0_8, %c0_9] : memref<1x9x8x4xbf16, #tpu.memory_space<vmem>>, vector<1x1x8x4xbf16>
    %8 = vector.shape_cast %7 : vector<1x1x8x4xbf16> to vector<8x4xbf16>
    %cst_10 = arith.constant dense<0.000000e+00> : vector<8x288xf32>
    %9 = tpu.matmul %8, %6, %cst_10 {dimension_numbers = #tpu.dot_dimension_numbers<[1], [0], [0], [1], [0, 0, 1, 1], [], []>} : vector<8x4xbf16>, vector<4x288xbf16>, vector<8x288xf32> -> vector<8x288xf32>
    %10 = arith.addf %5, %9 : vector<8x288xf32>
    %11 = vector.extract_strided_slice %1 {offsets = [0, 2], sizes = [4, 288], strides = [1, 1]} : vector<4x326xbf16> to vector<4x288xbf16>
    %c0_11 = arith.constant 0 : index
    %c2 = arith.constant 2 : index
    %c0_12 = arith.constant 0 : index
    %c0_13 = arith.constant 0 : index
    %12 = vector.load %arg3[%c0_11, %c2, %c0_12, %c0_13] : memref<1x9x8x4xbf16, #tpu.memory_space<vmem>>, vector<1x1x8x4xbf16>
    %13 = vector.shape_cast %12 : vector<1x1x8x4xbf16> to vector<8x4xbf16>
    %cst_14 = arith.constant dense<0.000000e+00> : vector<8x288xf32>
    %14 = tpu.matmul %13, %11, %cst_14 {dimension_numbers = #tpu.dot_dimension_numbers<[1], [0], [0], [1], [0, 0, 1, 1], [], []>} : vector<8x4xbf16>, vector<4x288xbf16>, vector<8x288xf32> -> vector<8x288xf32>
    %15 = arith.addf %10, %14 : vector<8x288xf32>
    %16 = vector.extract_strided_slice %1 {offsets = [0, 18], sizes = [4, 288], strides = [1, 1]} : vector<4x326xbf16> to vector<4x288xbf16>
    %c0_15 = arith.constant 0 : index
    %c3 = arith.constant 3 : index
    %c0_16 = arith.constant 0 : index
    %c0_17 = arith.constant 0 : index
    %17 = vector.load %arg3[%c0_15, %c3, %c0_16, %c0_17] : memref<1x9x8x4xbf16, #tpu.memory_space<vmem>>, vector<1x1x8x4xbf16>
    %18 = vector.shape_cast %17 : vector<1x1x8x4xbf16> to vector<8x4xbf16>
    %cst_18 = arith.constant dense<0.000000e+00> : vector<8x288xf32>
    %19 = tpu.matmul %18, %16, %cst_18 {dimension_numbers = #tpu.dot_dimension_numbers<[1], [0], [0], [1], [0, 0, 1, 1], [], []>} : vector<8x4xbf16>, vector<4x288xbf16>, vector<8x288xf32> -> vector<8x288xf32>
    %20 = arith.addf %15, %19 : vector<8x288xf32>
    %21 = vector.extract_strided_slice %1 {offsets = [0, 19], sizes = [4, 288], strides = [1, 1]} : vector<4x326xbf16> to vector<4x288xbf16>
    %c0_19 = arith.constant 0 : index
    %c4 = arith.constant 4 : index
    %c0_20 = arith.constant 0 : index
    %c0_21 = arith.constant 0 : index
    %22 = vector.load %arg3[%c0_19, %c4, %c0_20, %c0_21] : memref<1x9x8x4xbf16, #tpu.memory_space<vmem>>, vector<1x1x8x4xbf16>
    %23 = vector.shape_cast %22 : vector<1x1x8x4xbf16> to vector<8x4xbf16>
    %cst_22 = arith.constant dense<0.000000e+00> : vector<8x288xf32>
    %24 = tpu.matmul %23, %21, %cst_22 {dimension_numbers = #tpu.dot_dimension_numbers<[1], [0], [0], [1], [0, 0, 1, 1], [], []>} : vector<8x4xbf16>, vector<4x288xbf16>, vector<8x288xf32> -> vector<8x288xf32>
    %25 = arith.addf %20, %24 : vector<8x288xf32>
    %26 = vector.extract_strided_slice %1 {offsets = [0, 20], sizes = [4, 288], strides = [1, 1]} : vector<4x326xbf16> to vector<4x288xbf16>
    %c0_23 = arith.constant 0 : index
    %c5 = arith.constant 5 : index
    %c0_24 = arith.constant 0 : index
    %c0_25 = arith.constant 0 : index
    %27 = vector.load %arg3[%c0_23, %c5, %c0_24, %c0_25] : memref<1x9x8x4xbf16, #tpu.memory_space<vmem>>, vector<1x1x8x4xbf16>
    %28 = vector.shape_cast %27 : vector<1x1x8x4xbf16> to vector<8x4xbf16>
    %cst_26 = arith.constant dense<0.000000e+00> : vector<8x288xf32>
    %29 = tpu.matmul %28, %26, %cst_26 {dimension_numbers = #tpu.dot_dimension_numbers<[1], [0], [0], [1], [0, 0, 1, 1], [], []>} : vector<8x4xbf16>, vector<4x288xbf16>, vector<8x288xf32> -> vector<8x288xf32>
    %30 = arith.addf %25, %29 : vector<8x288xf32>
    %31 = vector.extract_strided_slice %1 {offsets = [0, 36], sizes = [4, 288], strides = [1, 1]} : vector<4x326xbf16> to vector<4x288xbf16>
    %c0_27 = arith.constant 0 : index
    %c6 = arith.constant 6 : index
    %c0_28 = arith.constant 0 : index
    %c0_29 = arith.constant 0 : index
    %32 = vector.load %arg3[%c0_27, %c6, %c0_28, %c0_29] : memref<1x9x8x4xbf16, #tpu.memory_space<vmem>>, vector<1x1x8x4xbf16>
    %33 = vector.shape_cast %32 : vector<1x1x8x4xbf16> to vector<8x4xbf16>
    %cst_30 = arith.constant dense<0.000000e+00> : vector<8x288xf32>
    %34 = tpu.matmul %33, %31, %cst_30 {dimension_numbers = #tpu.dot_dimension_numbers<[1], [0], [0], [1], [0, 0, 1, 1], [], []>} : vector<8x4xbf16>, vector<4x288xbf16>, vector<8x288xf32> -> vector<8x288xf32>
    %35 = arith.addf %30, %34 : vector<8x288xf32>
    %36 = vector.extract_strided_slice %1 {offsets = [0, 37], sizes = [4, 288], strides = [1, 1]} : vector<4x326xbf16> to vector<4x288xbf16>
    %c0_31 = arith.constant 0 : index
    %c7 = arith.constant 7 : index
    %c0_32 = arith.constant 0 : index
    %c0_33 = arith.constant 0 : index
    %37 = vector.load %arg3[%c0_31, %c7, %c0_32, %c0_33] : memref<1x9x8x4xbf16, #tpu.memory_space<vmem>>, vector<1x1x8x4xbf16>
    %38 = vector.shape_cast %37 : vector<1x1x8x4xbf16> to vector<8x4xbf16>
    %cst_34 = arith.constant dense<0.000000e+00> : vector<8x288xf32>
    %39 = tpu.matmul %38, %36, %cst_34 {dimension_numbers = #tpu.dot_dimension_numbers<[1], [0], [0], [1], [0, 0, 1, 1], [], []>} : vector<8x4xbf16>, vector<4x288xbf16>, vector<8x288xf32> -> vector<8x288xf32>
    %40 = arith.addf %35, %39 : vector<8x288xf32>
    %41 = vector.extract_strided_slice %1 {offsets = [0, 38], sizes = [4, 288], strides = [1, 1]} : vector<4x326xbf16> to vector<4x288xbf16>
    %c0_35 = arith.constant 0 : index
    %c8 = arith.constant 8 : index
    %c0_36 = arith.constant 0 : index
    %c0_37 = arith.constant 0 : index
    %42 = vector.load %arg3[%c0_35, %c8, %c0_36, %c0_37] : memref<1x9x8x4xbf16, #tpu.memory_space<vmem>>, vector<1x1x8x4xbf16>
    %43 = vector.shape_cast %42 : vector<1x1x8x4xbf16> to vector<8x4xbf16>
    %cst_38 = arith.constant dense<0.000000e+00> : vector<8x288xf32>
    %44 = tpu.matmul %43, %41, %cst_38 {dimension_numbers = #tpu.dot_dimension_numbers<[1], [0], [0], [1], [0, 0, 1, 1], [], []>} : vector<8x4xbf16>, vector<4x288xbf16>, vector<8x288xf32> -> vector<8x288xf32>
    %45 = arith.addf %40, %44 : vector<8x288xf32>
    %c0_i32 = arith.constant 0 : i32
    %46 = arith.cmpi eq, %arg1, %c0_i32 : i32
    %47 = arith.extui %46 : i1 to i32
    %c0_i32_39 = arith.constant 0 : i32
    %48 = arith.cmpi ne, %47, %c0_i32_39 : i32
    scf.if %48 {
      %c0_43 = arith.constant 0 : index
      %c0_44 = arith.constant 0 : index
      %55 = vector.load %arg5[%c0_43, %c0_44] : memref<8x288xf32, #tpu.memory_space<vmem>>, vector<8x288xf32>
      tpu.vector_store %arg5[%c0_43, %c0_44], %45 {strides = array<i32>} : memref<8x288xf32, #tpu.memory_space<vmem>>, vector<8x288xf32>,
    } else {
    }
    %c0_i32_40 = arith.constant 0 : i32
    %49 = arith.cmpi ne, %arg1, %c0_i32_40 : i32
    %50 = arith.extui %49 : i1 to i32
    %c0_i32_41 = arith.constant 0 : i32
    %51 = arith.cmpi ne, %50, %c0_i32_41 : i32
    scf.if %51 {
      %c0_43 = arith.constant 0 : index
      %c0_44 = arith.constant 0 : index
      %55 = vector.load %arg5[%c0_43, %c0_44] : memref<8x288xf32, #tpu.memory_space<vmem>>, vector<8x288xf32>
      %56 = arith.mulf %55, %45 : vector<8x288xf32>
      %c0_45 = arith.constant 0 : index
      %c0_46 = arith.constant 0 : index
      %57 = vector.load %arg5[%c0_45, %c0_46] : memref<8x288xf32, #tpu.memory_space<vmem>>, vector<8x288xf32>
      tpu.vector_store %arg5[%c0_45, %c0_46], %56 {strides = array<i32>} : memref<8x288xf32, #tpu.memory_space<vmem>>, vector<8x288xf32>,
    } else {
    }
    %c1_i32 = arith.constant 1 : i32
    %52 = arith.cmpi eq, %arg1, %c1_i32 : i32
    %53 = arith.extui %52 : i1 to i32
    %c0_i32_42 = arith.constant 0 : i32
    %54 = arith.cmpi ne, %53, %c0_i32_42 : i32
    scf.if %54 {
      %c0_43 = arith.constant 0 : index
      %c0_44 = arith.constant 0 : index
      %55 = vector.load %arg5[%c0_43, %c0_44] : memref<8x288xf32, #tpu.memory_space<vmem>>, vector<8x288xf32>
      %56 = math.sqrt %55 : vector<8x288xf32>
      %57 = arith.truncf %56 : vector<8x288xf32> to vector<8x288xbf16>
      %c0_45 = arith.constant 0 : index
      %c0_46 = arith.constant 0 : index
      %c0_47 = arith.constant 0 : index
      %58 = vector.load %arg4[%c0_45, %c0_46, %c0_47] : memref<1x8x288xbf16, #tpu.memory_space<vmem>>, vector<1x8x288xbf16>
      %59 = vector.shape_cast %58 : vector<1x8x288xbf16> to vector<8x288xbf16>
      %60 = vector.shape_cast %57 : vector<8x288xbf16> to vector<1x8x288xbf16>
      tpu.vector_store %arg4[%c0_45, %c0_46, %c0_47], %60 {strides = array<i32>} : memref<1x8x288xbf16, #tpu.memory_space<vmem>>, vector<1x8x288xbf16>,
    } else {
    }
    return
  }
  func.func @transform_0(%arg0: i32, %arg1: i32) -> (i32, i32, i32, i32) {
    %c0_i32 = arith.constant 0 : i32
    %c0_i32_0 = arith.constant 0 : i32
    %c0_i32_1 = arith.constant 0 : i32
    return %arg0, %arg1, %c0_i32, %c0_i32_0 : i32, i32, i32, i32
  }
  func.func @transform_1(%arg0: i32, %arg1: i32) -> (i32, i32, i32, i32) {
    %c0_i32 = arith.constant 0 : i32
    %c0_i32_0 = arith.constant 0 : i32
    %c0_i32_1 = arith.constant 0 : i32
    %c0_i32_2 = arith.constant 0 : i32
    return %arg1, %c0_i32, %c0_i32_0, %c0_i32_1 : i32, i32, i32, i32
  }
  func.func @transform_2(%arg0: i32, %arg1: i32) -> (i32, i32, i32) {
    %c0_i32 = arith.constant 0 : i32
    %c0_i32_0 = arith.constant 0 : i32
    %c0_i32_1 = arith.constant 0 : i32
    return %arg0, %c0_i32, %c0_i32_0 : i32, i32, i32
  }
}

</mosaic_0001>

<bundles_post_ra>
// kernel: tpu_custom_call.1
= control target key start
LH: loop header
LB: loop body
LE: loop exit
PB: predicated region body
PF: predicated region fallthrough
CT: control target
= control target key end

     0   :  { %7 = vsyncpa [#allocation4], 0  ;;  %s1470_s0 = inlined_call_operand.vmem [shape: bf16[2,2,4,326], index: 0, kind: input, shape index: {}]   ;;  %s1471_s1 = inlined_call_operand.vmem [shape: bf16[2,9,8,4], index: 1, kind: input, shape index: {}]   ;;  %s1472_s2 = inlined_call_operand.hbm [shape: bf16[2,8,288], index: 2, kind: output, shape index: {}]  }
   0x1   :  { %9 = vsyncpa [#allocation4 + $0x1], 0  ;;  %s1254_s9 = smov 0   ;;  %s1256_s10 = smov 0  }
   0x2   :  { %s1258_s11 = smov 0   ;;  %s1260_s12 = smov 0  }
   0x3   :  { %s1262_s13 = smov 0   ;;  %s1264_s14 = smov 0  }
   0x4   :  { %s1266_s15 = smov 0   ;;  %s1268_s16 = smov 0  }
   0x5 LB: > { %s997_s17 = sadd.s32 4294967295, %s1229_s16   ;;  %s998_s18 = sadd.s32 4294967294, %s1229_s16   ;;  %s1229_s16 = sphi %s1268_s16, %s15_s16   ;;  %s1225_s15 = sphi %s1266_s15, %s1481_s15   ;;  %s1221_s14 = sphi %s1264_s14, %s1480_s14   ;;  %s1217_s13 = sphi %s1262_s13, %s1479_s13   ;;  %s1213_s12 = sphi %s1260_s12, %s1478_s12   ;;  %s1209_s11 = sphi %s1258_s11, %s1477_s11   ;;  %s1205_s10 = sphi %s1256_s10, %s1476_s10   ;;  %s1201_s9 = sphi %s1254_s9, %s1475_s9  }
   0x6   : > { %s24_s19 = sadd.s32 1, %s1221_s14  ;;  %s27_s20 = sadd.s32 1, %s1225_s15 }
   0x7   : > { %p25_p0 = scmp.ge.s32.totalorder %s24_s19, 2  ;;  %p98_p1 = scmp.ne.s32.totalorder %s1209_s11, %s1205_s10 }
   0x8   : > { %p99_p2 = scmp.eq.s32.totalorder %s997_s17, 3  ;;  %p104_p4 = scmp.ne.s32.totalorder %s1205_s10, %s1201_s9 }
   0x9   : > { %s1483_s19 = smov (%p25_p0, %s24_s19), 0  ;;  %s1485_s20 = smov (!%p25_p0, %s27_s20), %s1225_s15 }
   0xa   : > { %p1303_p3 = por %p99_p2, %p98_p1  ;;  %p29_p5 = scmp.ge.s32.totalorder %s1485_s20, 2 }
   0xb   : > { %p105_p6 = scmp.eq.s32.totalorder %s998_s18, 3  ;;  %p1001_p7 = scmp.ge.s32.totalorder %s1229_s16, 1 }
   0xc   : > { %p143_p8 = scmp.lt.s32.totalorder %s1229_s16, 5  ;;  %s1487_s20 = smov (%p29_p5, %s1485_s20), 0 }
   0xd   : > { %p1313_p9 = por %p105_p6, %p104_p4  ;;  %s85_s23 = ssub.s32 %s1225_s15, %s1487_s20 }
   0xe   : > { %p144_p10 = pnand %p1001_p7, %p143_p8  ;;  %s88_s24 = sadd.s32 1, %s1209_s11 }
   0xf   : > { %p86_p11 = scmp.eq.s32.totalorder %s85_s23, 0  ;;  %p174_p12 = scmp.lt.s32.totalorder (!%p144_p10), %s1217_s13, 1 }
  0x10   : > { %147 = sbr.rel (%p144_p10) target bundleno = 462 (0x1ce), region = 28  ;;  %p176_p13 = scmp.lt.s32.totalorder (!%p144_p10), %s1213_s12, 1 }
  0x11   : > { %s1321_s25 = scalar_select %p86_p11, %s1209_s11, %s88_s24  }
  0x12   : > { %s171_s7 = sand.u32 (!%p144_p10), 1, %s1205_s10   ;;  %s1231_s17 = smov (!%p144_p10), 127  }
  0x13   : > { %s1336_s8 = smul.u32 (!%p144_p10), 12, %s171_s7  ;;  %s1232_s18 = smov (!%p144_p10), 126  }
  0x14   : > { %s1233_s23 = smov (!%p144_p10), 110   ;;  %s1234_s24 = smov (!%p144_p10), 109  }
  0x15   : > { %s175_s26 = scalar_select %p174_p12, %s1217_s13, 1  ;;  %vm214_vm0 = vcmask 1041408   ;;  %vm210_vm1 = vcmask 31744   ;;  %vm207_vm2 = vcmask 1039360   ;;  %vm330_vm3 = vcmask 1031168  }
  0x16   : > { %s1327_s27 = scalar_select %p176_p13, %s1213_s12, 1  ;;  %vm402_vm4 = vcmask 900096   ;;  %vm474_vm5 = vcmask 891904   ;;  %vm546_vm6 = vcmask 883712   ;;  %vm618_vm7 = vcmask 752640  }
  0x17   : > { %s1047_s28 = smul.u32 6, %s175_s26  ;;  %s1235_s26 = smov 108   ;;  %vm690_vm8 = vcmask 744448   ;;  %vm762_vm9 = vcmask 736256  }
  0x18   : > { %s1046_s29 = smul.u32 3, %s1327_s27  ;;  %p1039_p0 = scmp.ne.s32.totalorder %s1213_s12, 0 }
  0x1a   : > { %s180_s30 = sadd.s32 %s1047_s28, %s1046_s29  ;;  %s1236_s28 = smov 92  }
  0x1b   : > { %s1002_s3 = sshll.u32 %s180_s30, 1  ;;  %s1237_s29 = smov 91  }
  0x1c   : > { %s182_s6 = scalar_lea.vmem %s1470_s0, %s1002_s3  ;;  %s1238_s30 = smov 90  }
  0x1d   : > { %v189_v0 = vld [vmem:[%s182_s6] sm:$0x3f]  ;;  %s1048_s3 = smul.u32 36, %s1327_s27  ;;  %s1418_s27 = scalar_lea.vmem [#allocation3], %s1336_s8 }
  0x1e   : > { %194 = vst [vmem:[#allocation1] ss:$4 sm:$0xff] %v189_v0 }
  0x1f   : > { %s1347_s6 = scalar_lea.vmem %s1471_s1, %s1048_s3 }
  0x20   : > { %v190_v29 = vld [vmem:[%s1347_s6] sm:$0xf]  ;;  %v1004_v37 = vld [vmem:[%s1347_s6 + $0x4] sm:$0xf]  ;;  %v1011_v41 = vld [vmem:[%s1347_s6 + $0x8] sm:$0xf] }
  0x21   : > { %v1015_v58 = vld [vmem:[%s1347_s6 + $0xc] sm:$0xf] }
  0x25   : > { %v199_v1 = vld.sshfl [vmem:[#allocation1 + $0x10] sm:$0xff pattern:$0x73625140]  ;;  %v197_v2 = vld.sshfl [vmem:[#allocation1 + $0x8] sm:$0xff pattern:$0x73625140] }
  0x26   : > { %205 = vrot.lane.b32.xlu0 %v199_v1, %s1231_s17  ;;  %203 = vrot.lane.b32.xlu1 %v197_v2, %s1231_s17  ;;  %v195_v3 = vld.sshfl [vmem:[#allocation1] sm:$0xff pattern:$0x73625140] }
  0x27   : > { %263 = vst [vmem:[#allocation1] ss:$4 sm:$0xff] %v189_v0 }
  0x2e   : > { %201 = vrot.lane.b32.xlu0 %v195_v3, %s1231_s17  ;;  %v264_v4 = vld.sshfl [vmem:[#allocation1] sm:$0xff pattern:$0x73625140]  ;;  %v1338_v5 = vld.sshfl [vmem:[#allocation1 + $0x8] sm:$0xff pattern:$0x73625140] }
  0x2f   : > { %v1340_v6 = vld.sshfl [vmem:[#allocation1 + $0x10] sm:$0xff pattern:$0x73625140]  ;;  %v270_v28 = vsel %vm214_vm0, %v264_v4, 0  ;;  %v272_v44 = vsel %vm214_vm0, %v1338_v5, 0 }
  0x30   : > { %317 = vst [vmem:[#allocation1] ss:$4 sm:$0xff] %v189_v0  ;;  %283 = vmatpush.bf16.msra.mxu3 %v270_v28  ;;  %v274_v35 = vsel %vm214_vm0, %v1340_v6, 0 }
  0x33   : > { %1008 = vmatmul.msk.bf16.vlgmr.msra.gmra.mxu3 %vm210_vm1, %v190_v29 }
  0x37   : > { %v318_v7 = vld.sshfl [vmem:[#allocation1] sm:$0xff pattern:$0x73625140]  ;;  %v320_v8 = vld.sshfl [vmem:[#allocation1 + $0x8] sm:$0xff pattern:$0x73625140] }
  0x38   : > { %324 = vrot.lane.b32.xlu1 %v318_v7, %s1232_s18  ;;  %326 = vrot.lane.b32.xlu2 %v320_v8, %s1232_s18  ;;  %v322_v9 = vld.sshfl [vmem:[#allocation1 + $0x10] sm:$0xff pattern:$0x73625140] }
  0x39   : > { %389 = vst [vmem:[#allocation1] ss:$4 sm:$0xff] %v189_v0  ;;  %v1023_v8 = vld [vmem:[%s1347_s6 + $0x14] sm:$0xf] }
  0x40   : > { %v394_v10 = vld.sshfl [vmem:[#allocation1 + $0x10] sm:$0xff pattern:$0x73625140]  ;;  %v390_v11 = vld.sshfl [vmem:[#allocation1] sm:$0xff pattern:$0x73625140]  ;;  %328 = vrot.lane.b32.xlu2 %v322_v9, %s1232_s18 }
  0x41   : > { %400 = vrot.lane.b32.xlu1 %v394_v10, %s1233_s23  ;;  %v392_v12 = vld.sshfl [vmem:[#allocation1 + $0x8] sm:$0xff pattern:$0x73625140]  ;;  %v1019_v9 = vld [vmem:[%s1347_s6 + $0x10] sm:$0xf] }
  0x42   : > { %398 = vrot.lane.b32.xlu0 %v392_v12, %s1233_s23  ;;  %461 = vst [vmem:[#allocation1] ss:$4 sm:$0xff] %v189_v0 }
  0x48   : > { %396 = vrot.lane.b32.xlu2 %v390_v11, %s1233_s23 }
  0x49   : > { %v466_v13 = vld.sshfl [vmem:[#allocation1 + $0x10] sm:$0xff pattern:$0x73625140]  ;;  %v464_v14 = vld.sshfl [vmem:[#allocation1 + $0x8] sm:$0xff pattern:$0x73625140] }
  0x4a   : > { %472 = vrot.lane.b32.xlu0 %v466_v13, %s1234_s24  ;;  %v462_v15 = vld.sshfl [vmem:[#allocation1] sm:$0xff pattern:$0x73625140] }
  0x4b   : > { %468 = vrot.lane.b32.xlu1 %v462_v15, %s1234_s24  ;;  %533 = vst [vmem:[#allocation1] ss:$4 sm:$0xff] %v189_v0 }
  0x50   : > { %470 = vrot.lane.b32.xlu2 %v464_v14, %s1234_s24 }
  0x52   : > { %v536_v16 = vld.sshfl [vmem:[#allocation1 + $0x8] sm:$0xff pattern:$0x73625140]  ;;  %v534_v17 = vld.sshfl [vmem:[#allocation1] sm:$0xff pattern:$0x73625140] }
  0x53   : > { %542 = vrot.lane.b32.xlu1 %v536_v16, %s1235_s26  ;;  %540 = vrot.lane.b32.xlu0 %v534_v17, %s1235_s26  ;;  %v538_v18 = vld.sshfl [vmem:[#allocation1 + $0x10] sm:$0xff pattern:$0x73625140] }
  0x54   : > { %605 = vst [vmem:[#allocation1] ss:$4 sm:$0xff] %v189_v0 }
  0x5b   : > { %544 = vrot.lane.b32.xlu1 %v538_v18, %s1235_s26  ;;  %v610_v19 = vld.sshfl [vmem:[#allocation1 + $0x10] sm:$0xff pattern:$0x73625140]  ;;  %v608_v20 = vld.sshfl [vmem:[#allocation1 + $0x8] sm:$0xff pattern:$0x73625140] }
  0x5c   : > { %614 = vrot.lane.b32.xlu0 %v608_v20, %s1236_s28  ;;  %v606_v21 = vld.sshfl [vmem:[#allocation1] sm:$0xff pattern:$0x73625140] }
  0x5d   : > { %612 = vrot.lane.b32.xlu2 %v606_v21, %s1236_s28  ;;  %677 = vst [vmem:[#allocation1] ss:$4 sm:$0xff] %v189_v0 }
  0x64   : > { %v678_v22 = vld.sshfl [vmem:[#allocation1] sm:$0xff pattern:$0x73625140]  ;;  %v682_v23 = vld.sshfl [vmem:[#allocation1 + $0x10] sm:$0xff pattern:$0x73625140] }
  0x65   : > { %688 = vrot.lane.b32.xlu1 %v682_v23, %s1237_s29  ;;  %v680_v24 = vld.sshfl [vmem:[#allocation1 + $0x8] sm:$0xff pattern:$0x73625140]  ;;  %616 = vrot.lane.b32.xlu2 %v610_v19, %s1236_s28 }
  0x66   : > { %686 = vrot.lane.b32.xlu0 %v680_v24, %s1237_s29  ;;  %749 = vst [vmem:[#allocation1] ss:$4 sm:$0xff] %v189_v0 }
  0x6d   : > { %v754_v25 = vld.sshfl [vmem:[#allocation1 + $0x10] sm:$0xff pattern:$0x73625140]  ;;  %v750_v26 = vld.sshfl [vmem:[#allocation1] sm:$0xff pattern:$0x73625140]  ;;  %684 = vrot.lane.b32.xlu2 %v678_v22, %s1237_s29 }
  0x6e   : > { %760 = vrot.lane.b32.xlu0 %v754_v25, %s1238_s30  ;;  %756 = vrot.lane.b32.xlu1 %v750_v26, %s1238_s30  ;;  %v752_v27 = vld.sshfl [vmem:[#allocation1 + $0x8] sm:$0xff pattern:$0x73625140] }
  0x75   : > { %758 = vrot.lane.b32.xlu2 %v752_v27, %s1238_s30  ;;  %v1027_v27 = vld [vmem:[%s1347_s6 + $0x18] sm:$0xf] }
  0x92   : > { %v327_v30 = vpop.permute.xlu2 %326 }
  0x98   : > { %v206_v31 = vpop.permute.xlu0 %205  ;;  %v204_v32 = vpop.permute.xlu1 %203 }
  0x99   : > { %v209_v33 = vsel %vm207_vm2, %v204_v32, %v206_v31  ;;  %v222_v34 = vsel %vm214_vm0, %v206_v31, 0 }
  0x9a   : > { %v219_v36 = vsel %vm214_vm0, %v209_v33, 0  ;;  %257 = vmatpush.bf16.msra.mxu2 %v222_v34  ;;  %v329_v38 = vpop.permute.xlu2 %328 }
  0x9b   : > { %244 = vmatpush.bf16.msra.mxu1 %v219_v36  ;;  %v332_v39 = vsel %vm330_vm3, %v327_v30, %v329_v38  ;;  %v343_v46 = vsel %vm214_vm0, %v329_v38, 0  ;;  %v1031_v38 = vld [vmem:[%s1347_s6 + $0x1c] sm:$0xf] }
  0x9c   : > { %v340_v40 = vsel %vm214_vm0, %v332_v39, 0  ;;  %v1035_v39 = vld [vmem:[%s1347_s6 + $0x20] sm:$0xf] }
  0x9d   : > { %1007 = vmatmul.msk.bf16.vlgmr.msra.gmra.mxu2 %vm210_vm1, %v1004_v37  ;;  %365 = vmatpush.bf16.msrb.mxu3 %v340_v40 }
  0x9e   : > { %1006 = vmatmul.msk.bf16.vlgmr.msra.gmra.mxu1 %vm210_vm1, %v1004_v37 }
  0x9f   : > { %309 = vmatpush.bf16.msrb.mxu1 %v274_v35 }
  0xa0   : > { %v202_v42 = vpop.permute.xlu0 %201  ;;  %1013 = vmatmul.msk.bf16.vlgmr.msrb.gmra.mxu3 %vm210_vm1, %v1011_v41 }
  0xa1   : > { %v208_v43 = vsel %vm207_vm2, %v202_v42, %v204_v32 }
  0xa2   : > { %v216_v45 = vsel %vm214_vm0, %v208_v43, 0  ;;  %v397_v50 = vpop.permute.xlu2 %396 }
  0xa3   : > { %231 = vmatpush.bf16.msra.mxu0 %v216_v45 }
  0xa6   : > { %1005 = vmatmul.msk.bf16.vlgmr.msra.gmra.mxu0 %vm210_vm1, %v1004_v37 }
  0xa7   : > { %296 = vmatpush.bf16.msrb.mxu0 %v272_v44 }
  0xaa   : > { %v325_v47 = vpop.permute.xlu1 %324  ;;  %v471_v59 = vpop.permute.xlu2 %470 }
  0xab   : > { %378 = vmatpush.bf16.msra.mxu0 %v343_v46  ;;  %v331_v48 = vsel %vm330_vm3, %v325_v47, %v327_v30 }
  0xac   : > { %v337_v49 = vsel %vm214_vm0, %v331_v48, 0 }
  0xad   : > { %352 = vmatpush.bf16.msrb.mxu2 %v337_v49 }
  0xae   : > { %1010 = vmatmul.msk.bf16.vlgmr.msrb.gmra.mxu1 %vm210_vm1, %v190_v29 }
  0xb0   : > { %1012 = vmatmul.msk.bf16.vlgmr.msrb.gmra.mxu2 %vm210_vm1, %v1011_v41 }
  0xb3   : > { %v401_v51 = vpop.permute.xlu1 %400 }
  0xb4   : > { %v415_v52 = vsel %vm214_vm0, %v401_v51, 0  ;;  %v399_v53 = vpop.permute.xlu0 %398 }
  0xb5   : > { %v404_v54 = vsel %vm402_vm4, %v399_v53, %v401_v51  ;;  %v403_v55 = vsel %vm402_vm4, %v397_v50, %v399_v53  ;;  %450 = vmatpush.bf16.msra.mxu3 %v415_v52 }
  0xb6   : > { %1009 = vmatmul.msk.bf16.vlgmr.msrb.gmra.mxu0 %vm210_vm1, %v190_v29  ;;  %v412_v56 = vsel %vm214_vm0, %v404_v54, 0  ;;  %v409_v57 = vsel %vm214_vm0, %v403_v55, 0  ;;  %v285_v40 = vpop.f32.mrf.mxu3 }
  0xb7   : > { %424 = vmatpush.bf16.msra.mxu1 %v409_v57  ;;  %437 = vmatpush.bf16.msra.mxu2 %v412_v56  ;;  %v613_v3 = vpop.permute.xlu2 %612 }
  0xb8   : > { %1018 = vmatmul.msk.bf16.vlgmr.msra.gmra.mxu3 %vm210_vm1, %v1015_v58 }
  0xbc   : > { %v473_v60 = vpop.permute.xlu0 %472 }
  0xbd   : > { %v487_v61 = vsel %vm214_vm0, %v473_v60, 0  ;;  %v469_v62 = vpop.permute.xlu1 %468  ;;  %v476_v63 = vsel %vm474_vm5, %v471_v59, %v473_v60 }
  0xbe   : > { %1016 = vmatmul.msk.bf16.vlgmr.msra.gmra.mxu1 %vm210_vm1, %v1015_v58  ;;  %v475_v0 = vsel %vm474_vm5, %v469_v62, %v471_v59  ;;  %v484_v1 = vsel %vm214_vm0, %v476_v63, 0  ;;  %522 = vmatpush.bf16.msrb.mxu2 %v487_v61 }
  0xbf   : > { %v481_v2 = vsel %vm214_vm0, %v475_v0, 0  ;;  %509 = vmatpush.bf16.msrb.mxu1 %v484_v1  ;;  %v617_v10 = vpop.permute.xlu2 %616 }
  0xc0   : > { %1017 = vmatmul.msk.bf16.vlgmr.msra.gmra.mxu2 %vm210_vm1, %v1015_v58  ;;  %496 = vmatpush.bf16.msrb.mxu0 %v481_v2  ;;  %v631_v20 = vsel %vm214_vm0, %v617_v10, 0 }
  0xc5   : > { %v543_v4 = vpop.permute.xlu1 %542  ;;  %v541_v5 = vpop.permute.xlu0 %540 }
  0xc6   : > { %1014 = vmatmul.msk.bf16.vlgmr.msra.gmra.mxu0 %vm210_vm1, %v1011_v41  ;;  %v547_v6 = vsel %vm546_vm6, %v541_v5, %v543_v4  ;;  %v287_v41 = vpop.f32.mrf.mxu3 }
  0xc7   : > { %v553_v7 = vsel %vm214_vm0, %v547_v6, 0  ;;  %v685_v21 = vpop.permute.xlu2 %684 }
  0xc8   : > { %568 = vmatpush.bf16.msrb.mxu3 %v553_v7 }
  0xcb   : > { %1024 = vmatmul.msk.bf16.vlgmr.msrb.gmra.mxu3 %vm210_vm1, %v1023_v8 }
  0xcd   : > { %v545_v11 = vpop.permute.xlu1 %544 }
  0xce   : > { %1021 = vmatmul.msk.bf16.vlgmr.msrb.gmra.mxu1 %vm210_vm1, %v1019_v9  ;;  %v548_v12 = vsel %vm546_vm6, %v543_v4, %v545_v11  ;;  %v559_v13 = vsel %vm214_vm0, %v545_v11, 0  ;;  %v615_v14 = vpop.permute.xlu0 %614 }
  0xcf   : > { %v556_v15 = vsel %vm214_vm0, %v548_v12, 0  ;;  %v619_v16 = vsel %vm618_vm7, %v613_v3, %v615_v14  ;;  %v620_v17 = vsel %vm618_vm7, %v615_v14, %v617_v10  ;;  %594 = vmatpush.bf16.msra.mxu1 %v559_v13  ;;  %v759_v30 = vpop.permute.xlu2 %758 }
  0xd0   : > { %1022 = vmatmul.msk.bf16.vlgmr.msrb.gmra.mxu2 %vm210_vm1, %v1019_v9  ;;  %v625_v18 = vsel %vm214_vm0, %v619_v16, 0  ;;  %v628_v19 = vsel %vm214_vm0, %v620_v17, 0  ;;  %581 = vmatpush.bf16.msra.mxu0 %v556_v15 }
  0xd1   : > { %640 = vmatpush.bf16.msra.mxu2 %v625_v18  ;;  %653 = vmatpush.bf16.msra.mxu3 %v628_v19 }
  0xd6   : > { %1020 = vmatmul.msk.bf16.vlgmr.msrb.gmra.mxu0 %vm210_vm1, %v1019_v9 }
  0xd7   : > { %666 = vmatpush.bf16.msrb.mxu0 %v631_v20  ;;  %v689_v22 = vpop.permute.xlu1 %688 }
  0xd8   : > { %v703_v23 = vsel %vm214_vm0, %v689_v22, 0  ;;  %v687_v24 = vpop.permute.xlu0 %686 }
  0xd9   : > { %v692_v25 = vsel %vm690_vm8, %v687_v24, %v689_v22  ;;  %v691_v26 = vsel %vm690_vm8, %v685_v21, %v687_v24  ;;  %738 = vmatpush.bf16.msrb.mxu3 %v703_v23 }
  0xda   : > { %v700_v28 = vsel %vm214_vm0, %v692_v25, 0  ;;  %v697_v29 = vsel %vm214_vm0, %v691_v26, 0 }
  0xdb   : > { %1029 = vmatmul.msk.bf16.vlgmr.msra.gmra.mxu3 %vm210_vm1, %v1027_v27  ;;  %712 = vmatpush.bf16.msrb.mxu1 %v697_v29 }
  0xdc   : > { %725 = vmatpush.bf16.msrb.mxu2 %v700_v28 }
  0xde   : > { %1026 = vmatmul.msk.bf16.vlgmr.msra.gmra.mxu1 %vm210_vm1, %v1023_v8 }
  0xe0   : > { %1028 = vmatmul.msk.bf16.vlgmr.msra.gmra.mxu2 %vm210_vm1, %v1027_v27  ;;  %v761_v31 = vpop.permute.xlu0 %760  ;;  %v757_v32 = vpop.permute.xlu1 %756 }
  0xe1   : > { %v775_v33 = vsel %vm214_vm0, %v761_v31, 0  ;;  %v764_v34 = vsel %vm762_vm9, %v759_v30, %v761_v31  ;;  %v763_v35 = vsel %vm762_vm9, %v757_v32, %v759_v30 }
  0xe2   : > { %v772_v36 = vsel %vm214_vm0, %v764_v34, 0  ;;  %810 = vmatpush.bf16.msra.mxu2 %v775_v33  ;;  %v769_v37 = vsel %vm214_vm0, %v763_v35, 0 }
  0xe3   : > { %797 = vmatpush.bf16.msra.mxu1 %v772_v36 }
  0xe6   : > { %1025 = vmatmul.msk.bf16.vlgmr.msra.gmra.mxu0 %vm210_vm1, %v1023_v8 }
  0xe7   : > { %784 = vmatpush.bf16.msra.mxu0 %v769_v37 }
  0xeb   : > { %1034 = vmatmul.msk.bf16.vlgmr.msrb.gmra.mxu3 %vm210_vm1, %v1031_v38 }
  0xee   : > { %1032 = vmatmul.msk.bf16.vlgmr.msrb.gmra.mxu1 %vm210_vm1, %v1031_v38 }
  0xf0   : > { %1033 = vmatmul.msk.bf16.vlgmr.msrb.gmra.mxu2 %vm210_vm1, %v1031_v38 }
  0xf6   : > { %1030 = vmatmul.msk.bf16.vlgmr.msrb.gmra.mxu0 %vm210_vm1, %v1027_v27 }
  0xfe   : > { %1037 = vmatmul.msk.bf16.vlgmr.msra.gmra.mxu1 %vm210_vm1, %v1035_v39 }
 0x100   : > { %1038 = vmatmul.msk.bf16.vlgmr.msra.gmra.mxu2 %vm210_vm1, %v1035_v39 }
 0x106   : > { %1036 = vmatmul.msk.bf16.vlgmr.msra.gmra.mxu0 %vm210_vm1, %v1035_v39 }
 0x11b   : > { %v246_v42 = vpop.f32.mrf.mxu1 }
 0x120   : > { %v259_v43 = vpop.f32.mrf.mxu2 }
 0x123   : > { %v233_v44 = vpop.f32.mrf.mxu0  ;;  %v248_v45 = vpop.f32.mrf.mxu1 }
 0x124   : > { %v286_v46 = vadd.f32 %v285_v40, %v233_v44  ;;  %v367_v47 = vpop.f32.mrf.mxu3 }
 0x128   : > { %v261_v48 = vpop.f32.mrf.mxu2 }
 0x12b   : > { %v235_v49 = vpop.f32.mrf.mxu0  ;;  %v311_v50 = vpop.f32.mrf.mxu1 }
 0x12c   : > { %v312_v51 = vadd.f32 %v311_v50, %v259_v43  ;;  %v369_v52 = vpop.f32.mrf.mxu3 }
 0x133   : > { %v354_v53 = vpop.f32.mrf.mxu2  ;;  %v298_v54 = vpop.f32.mrf.mxu0 }
 0x134   : > { %v384_v55 = vadd.f32 %v354_v53, %v286_v46  ;;  %v299_v56 = vadd.f32 %v298_v54, %v246_v42  ;;  %v313_v57 = vpop.f32.mrf.mxu1 }
 0x136   : > { %v385_v58 = vadd.f32 %v367_v47, %v299_v56 }
 0x13b   : > { %v356_v59 = vpop.f32.mrf.mxu2  ;;  %v300_v60 = vpop.f32.mrf.mxu0 }
 0x13c   : > { %v426_v61 = vpop.f32.mrf.mxu1  ;;  %v452_v62 = vpop.f32.mrf.mxu3 }
 0x13d   : > { %v456_v63 = vadd.f32 %v426_v61, %v384_v55 }
 0x143   : > { %v439_v0 = vpop.f32.mrf.mxu2  ;;  %v380_v1 = vpop.f32.mrf.mxu0 }
 0x144   : > { %v386_v2 = vadd.f32 %v380_v1, %v312_v51  ;;  %v428_v3 = vpop.f32.mrf.mxu1  ;;  %v454_v4 = vpop.f32.mrf.mxu3  ;;  %v457_v26 = vadd.f32 %v439_v0, %v385_v58 }
 0x146   : > { %v458_v5 = vadd.f32 %v452_v62, %v386_v2 }
 0x14b   : > { %v441_v6 = vpop.f32.mrf.mxu2  ;;  %v382_v7 = vpop.f32.mrf.mxu0 }
 0x14c   : > { %v511_v8 = vpop.f32.mrf.mxu1 }
 0x14d   : > { %v529_v27 = vadd.f32 %v511_v8, %v457_v26 }
 0x14e   : > { %v570_v9 = vpop.f32.mrf.mxu3 }
 0x153   : > { %v524_v10 = vpop.f32.mrf.mxu2  ;;  %v498_v11 = vpop.f32.mrf.mxu0 }
 0x154   : > { %v513_v12 = vpop.f32.mrf.mxu1  ;;  %v530_v34 = vadd.f32 %v524_v10, %v458_v5  ;;  %v528_v35 = vadd.f32 %v498_v11, %v456_v63 }
 0x156   : > { %v572_v13 = vpop.f32.mrf.mxu3  ;;  %v600_v42 = vadd.f32 %v570_v9, %v528_v35 }
 0x15b   : > { %v526_v14 = vpop.f32.mrf.mxu2  ;;  %v500_v15 = vpop.f32.mrf.mxu0 }
 0x15c   : > { %v596_v16 = vpop.f32.mrf.mxu1 }
 0x15d   : > { %v602_v39 = vadd.f32 %v596_v16, %v530_v34 }
 0x15e   : > { %v655_v17 = vpop.f32.mrf.mxu3 }
 0x163   : > { %v642_v18 = vpop.f32.mrf.mxu2  ;;  %v583_v19 = vpop.f32.mrf.mxu0 }
 0x164   : > { %v598_v20 = vpop.f32.mrf.mxu1  ;;  %v601_v31 = vadd.f32 %v583_v19, %v529_v27  ;;  %v672_v44 = vadd.f32 %v642_v18, %v600_v42 }
 0x166   : > { %v657_v21 = vpop.f32.mrf.mxu3  ;;  %v673_v33 = vadd.f32 %v655_v17, %v601_v31 }
 0x16b   : > { %v644_v22 = vpop.f32.mrf.mxu2  ;;  %v585_v23 = vpop.f32.mrf.mxu0 }
 0x16c   : > { %v714_v24 = vpop.f32.mrf.mxu1 }
 0x16d   : > { %v744_v45 = vadd.f32 %v714_v24, %v672_v44 }
 0x16e   : > { %v740_v25 = vpop.f32.mrf.mxu3 }
 0x173   : > { %v727_v28 = vpop.f32.mrf.mxu2  ;;  %v668_v29 = vpop.f32.mrf.mxu0 }
 0x174   : > { %v716_v30 = vpop.f32.mrf.mxu1  ;;  %v745_v36 = vadd.f32 %v727_v28, %v673_v33  ;;  %v674_v43 = vadd.f32 %v668_v29, %v602_v39 }
 0x176   : > { %v742_v32 = vpop.f32.mrf.mxu3  ;;  %v746_v46 = vadd.f32 %v740_v25, %v674_v43 }
 0x17b   : > { %v729_v37 = vpop.f32.mrf.mxu2  ;;  %v670_v38 = vpop.f32.mrf.mxu0 }
 0x17c   : > { %v799_v40 = vpop.f32.mrf.mxu1 }
 0x17d   : > { %v817_v41 = vadd.f32 %v799_v40, %v745_v36 }
 0x183   : > { %v812_v47 = vpop.f32.mrf.mxu2  ;;  %v786_v48 = vpop.f32.mrf.mxu0 }
 0x184   : > { %v818_v49 = vadd.f32 %v812_v47, %v746_v46  ;;  %v816_v50 = vadd.f32 %v786_v48, %v744_v45  ;;  %v801_v51 = vpop.f32.mrf.mxu1 }
 0x187   : > { %822 = sbr.rel (%p1039_p0) target bundleno = 399 (0x18f), region = 32 }
 0x18b   : > { %v788_v52 = vpop.f32.mrf.mxu0  ;;  %v814_v53 = vpop.f32.mrf.mxu2 }
 0x18c   : > { %823 = vst [vmem:[#allocation2] sm:$0xff] %v816_v50  ;;  %vm825_vm10 = vcmask 261120  }
 0x18d   : > { %824 = vst [vmem:[#allocation2 + $0x8] sm:$0xff] %v817_v41 }
 0x18e   : > { %826 = vst.msk [vmem:[#allocation2 + $0x10] sm:$0xff] %vm825_vm10, %v818_v49 }
 0x18f PF: > { %p1040_p1 = scmp.eq.s32.totalorder %s1213_s12, 0 }
 0x191   : > { %830 = sbr.rel (%p1040_p1) target bundleno = 412 (0x19c), region = 36 }
 0x196   : > { %v831_v54 = vld [vmem:[#allocation2] sm:$0xff]  ;;  %v832_v55 = vld [vmem:[#allocation2 + $0x8] sm:$0xff]  ;;  %v833_v56 = vld [vmem:[#allocation2 + $0x10] sm:$0xff]  ;;  %vm839_vm11 = vcmask 261120  }
 0x197   : > { %v834_v57 = vmul.f32 %v831_v54, %v816_v50  ;;  %v835_v58 = vmul.f32 %v832_v55, %v817_v41  ;;  %v836_v59 = vmul.f32 %v833_v56, %v818_v49 }
 0x199   : > { %837 = vst [vmem:[#allocation2] sm:$0xff] %v834_v57 }
 0x19a   : > { %838 = vst [vmem:[#allocation2 + $0x8] sm:$0xff] %v835_v58 }
 0x19b   : > { %840 = vst.msk [vmem:[#allocation2 + $0x10] sm:$0xff] %vm839_vm11, %v836_v59 }
 0x19c PF: > { %p1041_p2 = scmp.ne.s32.totalorder %s1213_s12, 1 }
 0x19e   : > { %844 = sbr.rel (%p1041_p2) target bundleno = 446 (0x1be), region = 40 }
 0x1a3   : > { %v845_v60 = vld [vmem:[#allocation2] sm:$0xff]  ;;  %v846_v61 = vld [vmem:[#allocation2 + $0x8] sm:$0xff]  ;;  %v847_v62 = vld [vmem:[#allocation2 + $0x10] sm:$0xff]  ;;  %vm887_vm2 = vcmask 257024  }
 0x1a4   : > { %1129 = vrsqrt.f32 %v845_v60  ;;  %vm855_vm12 = vcmp.eq.f32.partialorder %v845_v60, inf  ;;  %vm857_vm13 = vcmp.eq.f32.partialorder %v845_v60, 0.0  ;;  %v858_v15 = vand.u32 2147483648, %v845_v60 }
 0x1a5   : > { %1131 = vrsqrt.f32 %v846_v61  ;;  %vm867_vm14 = vcmp.eq.f32.partialorder %v846_v61, inf  ;;  %v870_v18 = vand.u32 2147483648, %v846_v61  ;;  %vm869_vm15 = vcmp.eq.f32.partialorder %v846_v61, 0.0 }
 0x1a6   : > { %1133 = vrsqrt.f32 %v847_v62  ;;  %vm879_vm0 = vcmp.eq.f32.partialorder %v847_v62, inf  ;;  %v882_v21 = vand.u32 2147483648, %v847_v62  ;;  %vm881_vm1 = vcmp.eq.f32.partialorder %v847_v62, 0.0 }
 0x1aa   : > { %v1130_v63 = vpop.eup %1129 }
 0x1ab   : > { %v1132_v0 = vpop.eup %1131  ;;  %v849_v1 = vmul.f32 %v1130_v63, %v845_v60 }
 0x1ac   : > { %v1134_v2 = vpop.eup %1133  ;;  %v861_v3 = vmul.f32 %v1132_v0, %v846_v61 }
 0x1ad   : > { %v850_v4 = vmul.f32 %v1130_v63, %v849_v1  ;;  %v873_v5 = vmul.f32 %v1134_v2, %v847_v62 }
 0x1ae   : > { %v862_v6 = vmul.f32 %v1132_v0, %v861_v3 }
 0x1af   : > { %v851_v7 = vmul.f32 0.5, %v850_v4  ;;  %v874_v8 = vmul.f32 %v1134_v2, %v873_v5 }
 0x1b0   : > { %v863_v9 = vmul.f32 0.5, %v862_v6 }
 0x1b1   : > { %v852_v10 = vsub.f32 1.5, %v851_v7  ;;  %v875_v11 = vmul.f32 0.5, %v874_v8 }
 0x1b2   : > { %v864_v12 = vsub.f32 1.5, %v863_v9 }
 0x1b3   : > { %v853_v13 = vmul.f32 %v1130_v63, %v852_v10  ;;  %v876_v14 = vsub.f32 1.5, %v875_v11 }
 0x1b4   : > { %v865_v16 = vmul.f32 %v1132_v0, %v864_v12 }
 0x1b5   : > { %v854_v17 = vmul.f32 %v853_v13, %v845_v60  ;;  %v877_v19 = vmul.f32 %v1134_v2, %v876_v14 }
 0x1b6   : > { %v866_v20 = vmul.f32 %v865_v16, %v846_v61 }
 0x1b7   : > { %v856_v22 = vsel %vm855_vm12, %v845_v60, %v854_v17  ;;  %v878_v23 = vmul.f32 %v877_v19, %v847_v62 }
 0x1b8   : > { %v859_v24 = vsel %vm857_vm13, %v858_v15, %v856_v22  ;;  %v868_v25 = vsel %vm867_vm14, %v846_v61, %v866_v20 }
 0x1b9   : > { %v871_v26 = vsel %vm869_vm15, %v870_v18, %v868_v25  ;;  %v880_v27 = vsel %vm879_vm0, %v847_v62, %v878_v23 }
 0x1ba   : > { %v884_v28 = vpack.c.bf16 %v871_v26, %v859_v24  ;;  %v883_v29 = vsel %vm881_vm1, %v882_v21, %v880_v27 }
 0x1bb   : > { %v885_v30 = vpack.c.bf16 %v883_v29, %v883_v29 }
 0x1bc   : > { %886 = vst [vmem:[%s1418_s27] sm:$0xff] %v884_v28 }
 0x1bd   : > { %888 = vst.msk [vmem:[%s1418_s27 + $0x8] sm:$0xf] %vm887_vm2, %v885_v30 }
 0x1be PF: > { %s1049_s12 = smul.u32 12, %s1217_s13  ;;  %s903_s8 = sshll.u32 %s1418_s27, 4  ;;  %s904_s8 = int_to_ptr.vmem [resolvable:$true] %s903_s8 }
 0x1bf   : > { %s890_s26 = scalar_lea.sflag [#allocation4], %s171_s7  ;;  %s1155_s13 = scalar_lea.hbm %s1472_s2, 24 }
 0x1c0   : > { %s901_s23 = scalar_lea.hbm %s1472_s2, %s1049_s12 }
 0x1c1   : > { %s905_s24 = sshll.u32 %s901_s23, 4  ;;  %s906_s24 = int_to_ptr.hbm [resolvable:$true] %s905_s24 }
 0x1c2   : > { %s1149_s28 = sshra.s32 %s906_s24, 4  ;;  %s1150_s28 = int_to_ptr.hbm [resolvable:$true] %s1149_s28 }
 0x1c3   : > { %s1151_s29 = scalar_lea.hbm %s1150_s28, 12  ;;  %p1156_p7 = scmp.lt.s32.totalorder %s1150_s28, %s1472_s2 }
 0x1c4   : > { %p1152_p4 = scmp.ne.s32.totalorder %s1150_s28, %s1151_s29  ;;  %p1157_p8 = scmp.lt.s32.totalorder %s1155_s13, %s1151_s29 }
 0x1c6   : > { %p1153_p5 = pnand %p1152_p4, %p1303_p3  ;;  %p1158_p10 = por %p1157_p8, %p1156_p7 }
 0x1c8   : > { %p1154_p6 = pneg %p1153_p5 }
 0x1ca   : > { %p1159_p11 = pnand %p1158_p10, %p1154_p6 }
 0x1cc   : > { %1162 = shalt.err (!%p1159_p11)
}
 0x1cd   : > { %1050 = dma.vmem_to_hbm [thread:$0]  (%p1303_p3), %s904_s8, 192, %s906_s24, %s890_s26  }
 0x1ce PF: > { %p1056_p12 = scmp.ge.s32.totalorder %s1229_s16, 2  ;;  %s917_s7 = sand.u32 1, %s1201_s9  }
 0x1cf   : > { %s918_s6 = scalar_lea.sflag [#allocation4], %s917_s7 }
 0x1d0   : > { %p1053_p13 = pnand %p1056_p12, %p1313_p9 }
 0x1d2   : > { %p1054_p0 = pneg %p1053_p13 }
 0x1d4   : > { %1196 = dma.done.wait (%p1054_p0), %s918_s6, 192  }
 0x1d5   : > { %1198 = vsyncadd (%p1054_p0), %s918_s6, 4294967104  ;;  %s15_s16 = sadd.s32 1, %s1229_s16   ;;  %s1475_s9 = smov %s1205_s10 }
 0x1d6   : > { %p12_p1 = scmp.ge.s32.totalorder %s15_s16, 6   ;;  %s1476_s10 = smov %s1209_s11 }
 0x1d7   : > { %s1477_s11 = smov %s1321_s25  ;;  %s1478_s12 = smov %s1221_s14 }
 0x1d8   : > { %s1479_s13 = smov %s1225_s15  ;;  %s1480_s14 = smov %s1483_s19 }
 0x1d9   : > { %s1481_s15 = smov %s1487_s20  ;;  %14 = sbr.rel (!%p12_p1) target bundleno = 5 (0x5), region = 86 }
 0x1de   :  { %924 = vsyncpa [#allocation4], 1 }
 0x1df   :  { %926 = vsyncpa [#allocation4 + $0x1], 1 }

</bundles_post_ra>
